<compile_context>
chip_gen: v7x
topology: tpu7x:2x2x1
jax: 0.10.0
libtpu: 0.0.40
codegen_flags: <defaults>
</compile_context>

<pallas_src>
import functools
import math

import jax
import jax.numpy as jnp
from jax import lax
from jax.experimental import pallas as pl
from jax.experimental.pallas import tpu as pltpu


def _round_up(x, m):
    return (x + m - 1) // m * m


# ----------------------------- Pallas kernel ------------------------------- #
def discriminator_kernel(patch_ref, mask_ref, w1_ref, b1_ref, fw_ref, fb_ref,
                         gamma_ref, beta_ref, wf_ref, bf_ref, out_ref,
                         *, P_valid, num_feat):
    # patch_ref : (k*k*Cin, P)       bf16  im2col slab (built in the wrapper)
    # mask_ref  : (P, 1)             f32   BN validity mask column
    # w1_ref    : (Cout, k*k*Cin)    bf16  first-conv weight matrix
    # b1_ref    : (Cout, 1)          f32
    # fw_ref    : (L, Cout, Cin)     bf16  1x1 conv weights
    # fb/gamma/beta_ref : (L, Cout, 1) f32
    # wf_ref    : (1, Cout)          bf16
    # bf_ref    : (1, 1)             f32 in SMEM
    # out_ref   : (1, P)             f32 (lane-dense)
    eps = 1e-5
    C = w1_ref.shape[0]
    inv_pv = 1.0 / float(P_valid)
    mask_col = mask_ref[...]                                     # (P, 1) f32

    # ---- first_layer: single K = k*k*Cin matmul on the im2col slab ----------
    y32 = jnp.dot(w1_ref[...], patch_ref[...],
                  preferred_element_type=jnp.float32) + b1_ref[...]
    y = y32.astype(jnp.bfloat16)                                 # (C, P) bf16

    # ---- feature_block: L x [1x1 conv, BatchNorm2d (batch stats), ReLU] -----
    for l in range(num_feat):                                    # static unroll
        z = jnp.dot(fw_ref[l], y,
                    preferred_element_type=jnp.float32) + fb_ref[l]   # (C,P) f32
        # fused masked sum / sum-of-squares: one (2C, P) @ (P, 1) MXU dot
        stats = jnp.dot(jnp.concatenate([z, z * z], axis=0), mask_col,
                        preferred_element_type=jnp.float32)      # (2C, 1)
        mu = stats[:C] * inv_pv
        var = jnp.maximum(stats[C:] * inv_pv - mu * mu, 0.0)     # biased variance
        zn = (z - mu) * lax.rsqrt(var + eps)
        zn = zn * gamma_ref[l] + beta_ref[l]
        y = jnp.maximum(zn, 0.0).astype(jnp.bfloat16)            # ReLU, bf16 store

    # ---- final_layer: 1x1 conv to 1 channel + sigmoid (EUP exp + EUP rcp) ---
    logits = jnp.dot(wf_ref[...], y,
                     preferred_element_type=jnp.float32) + bf_ref[0, 0]
    out_ref[...] = pl.reciprocal(1.0 + jnp.exp(-logits), approx=True)


# ------------------------------- JAX glue ----------------------------------- #
def _spectral_normalize(w_mat, n_iter=30):
    """Divide by the largest singular value (converged power iteration),
    matching the effective weight of nn.utils.spectral_norm at steady state."""
    u = jnp.ones((w_mat.shape[0],), jnp.float32)
    v = jnp.zeros((w_mat.shape[1],), jnp.float32)
    for _ in range(n_iter):
        v = w_mat.T @ u
        v = v / (jnp.linalg.norm(v) + 1e-12)
        u = w_mat @ v
        u = u / (jnp.linalg.norm(u) + 1e-12)
    sigma = u @ (w_mat @ v)
    return w_mat / sigma


def make_discriminator_params(key, d_chan=16, d_kernel_size=3, d_n_layers=4):
    """Deterministic synthetic parameters with PyTorch-equivalent shapes."""
    k = d_kernel_size
    num_feat = d_n_layers - 2
    keys = jax.random.split(key, 4 + 2 * num_feat)

    # first_layer weight (Cout, Cin, k, k) -> spectral norm over (Cout, Cin*k*k)
    w1 = jax.random.normal(keys[0], (d_chan, 3, k, k), jnp.float32) * 0.1
    w1_mat = _spectral_normalize(w1.reshape(d_chan, -1))     # (Cout, Cin*k*k)
    b1 = jax.random.normal(keys[1], (d_chan,), jnp.float32) * 0.05

    fw, fb = [], []
    for i in range(num_feat):
        w = jax.random.normal(keys[2 + 2 * i], (d_chan, d_chan), jnp.float32) * 0.1
        w = _spectral_normalize(w)                 # 1x1 conv weight (Cout, Cin)
        b = jax.random.normal(keys[3 + 2 * i], (d_chan,), jnp.float32) * 0.05
        fw.append(w)
        fb.append(b)
    fw = jnp.stack(fw) if num_feat else jnp.zeros((0, d_chan, d_chan), jnp.float32)
    fb = jnp.stack(fb) if num_feat else jnp.zeros((0, d_chan), jnp.float32)

    # BatchNorm2d defaults: weight=1, bias=0 (training-mode batch stats in kernel)
    gamma = jnp.ones((num_feat, d_chan), jnp.float32)
    beta = jnp.zeros((num_feat, d_chan), jnp.float32)

    wf = jax.random.normal(keys[-2], (1, d_chan), jnp.float32) * 0.1
    wf = _spectral_normalize(wf)
    bf = jax.random.normal(keys[-1], (1,), jnp.float32) * 0.05

    return dict(
        w1_mat=w1_mat.astype(jnp.bfloat16),        # (Cout, Cin*k*k)
        b1=b1.reshape(d_chan, 1),
        fw=fw.astype(jnp.bfloat16),
        fb=fb.reshape(num_feat, d_chan, 1),
        gamma=gamma.reshape(num_feat, d_chan, 1),
        beta=beta.reshape(num_feat, d_chan, 1),
        wf=wf.astype(jnp.bfloat16),
        bf=bf.reshape(1, 1),
    )


def _vmem_ceiling_bytes():
    """~75% of the per-core VMEM capacity (64 MiB on v7x, 128 MiB on v5e/v6e)."""
    try:
        cap = int(pltpu.get_tpu_info().vmem_capacity_bytes)
    except Exception:
        cap = 128 * 2**20
    return max(32 * 2**20, cap * 3 // 4)


@jax.jit
def discriminator_forward(x_nchw, w1_mat, b1, fw, fb, gamma, beta, wf, bf):
    n, cin, h, w = x_nchw.shape
    k = int(round(math.sqrt(w1_mat.shape[1] // cin)))
    ho, wo = h - k + 1, w - k + 1
    nhw = n * h * w
    p_comp = _round_up(nhw, 128)                       # lane-dense compute width
    l_img = _round_up(p_comp + (k - 1) * w + (k - 1), 128)
    p_valid = n * ho * wo
    num_feat = fw.shape[0]
    d_chan = w1_mat.shape[0]

    # channel-major flattened image, zero-padded on the right
    x_flat = jnp.transpose(x_nchw, (1, 0, 2, 3)).reshape(cin, nhw)
    x_flat = jnp.pad(x_flat, ((0, 0), (0, l_img - nhw)))

    # im2col slab (k*k*Cin, P) in bf16; row index = c*k*k + dy*k + dx matches
    # the row-major reshape of the (Cout, Cin, k, k) conv weight.
    slabs = [x_flat[:, dy * w + dx: dy * w + dx + p_comp]
             for dy in range(k) for dx in range(k)]
    patches = (jnp.stack(slabs, axis=1)
               .reshape(cin * k * k, p_comp).astype(jnp.bfloat16))

    # BN validity mask hoisted out of the kernel (no in-kernel integer divides)
    idx = jnp.arange(p_comp, dtype=jnp.int32)
    xp = idx % w
    yp = (idx // w) % h
    valid = (xp <= w - k) & (yp <= h - k) & (idx < nhw)
    mask_col = valid.astype(jnp.float32)[:, None]          # (P, 1)

    kernel = functools.partial(
        discriminator_kernel, P_valid=p_valid, num_feat=num_feat)

    flops = 2 * p_comp * d_chan * (k * k * cin + num_feat * (d_chan + 2) + 1)
    transcendentals = 2 * p_comp + num_feat * d_chan
    bytes_accessed = (patches.size * 2 + mask_col.size * 4 +
                      w1_mat.size * 2 + fw.size * 2 + wf.size * 2 +
                      4 * (b1.size + fb.size + gamma.size + beta.size + bf.size) +
                      4 * p_comp)

    # VMEM budget with headroom (whole-array resident design, no grid).
    est_bytes = (cin * k * k * p_comp * 2        # im2col slab (bf16)
                 + 3 * d_chan * p_comp * 4       # live f32 feature slabs
                 + 2 * d_chan * p_comp * 2       # bf16 activations
                 + 5 * p_comp)                   # mask + output
    vmem_limit = int(min(_vmem_ceiling_bytes(), max(32 * 2**20, 2 * est_bytes)))

    vmem_spec = pl.BlockSpec(memory_space=pltpu.MemorySpace.VMEM)
    smem_spec = pl.BlockSpec(memory_space=pltpu.MemorySpace.SMEM)

    out_flat = pl.pallas_call(
        kernel,
        out_shape=jax.ShapeDtypeStruct((1, p_comp), jnp.float32),
        in_specs=[vmem_spec, vmem_spec, vmem_spec, vmem_spec, vmem_spec,
                  vmem_spec, vmem_spec, vmem_spec, vmem_spec, smem_spec],
        out_specs=vmem_spec,
        compiler_params=pltpu.CompilerParams(vmem_limit_bytes=vmem_limit),
        cost_estimate=pl.CostEstimate(flops=flops,
                                      transcendentals=transcendentals,
                                      bytes_accessed=bytes_accessed),
    )(patches, mask_col, w1_mat, b1, fw, fb, gamma, beta, wf, bf)

    # back to NCHW: (N, 1, H_out, W_out)
    out = out_flat[0, :nhw].reshape(n, h, w)[:, :ho, :wo]
    return out[:, None, :, :]


# -------------------------- pure-JAX reference ------------------------------ #
def discriminator_reference(x_nchw, w1_mat, b1, fw, fb, gamma, beta, wf, bf):
    n, cin, h, w = x_nchw.shape
    k = int(round(math.sqrt(w1_mat.shape[1] // cin)))
    d_chan = w1_mat.shape[0]
    eps = 1e-5
    x = x_nchw.astype(jnp.float32)
    w1 = w1_mat.astype(jnp.float32).reshape(d_chan, cin, k, k)   # (Cout, Cin, k, k)
    y = lax.conv_general_dilated(x, w1, (1, 1), "VALID",
                                 dimension_numbers=("NCHW", "OIHW", "NCHW"))
    y = y + b1.reshape(1, d_chan, 1, 1)
    for l in range(fw.shape[0]):
        wl = fw[l].astype(jnp.float32)
        z = jnp.einsum("oi,nihw->nohw", wl, y) + fb[l].reshape(1, d_chan, 1, 1)
        mu = jnp.mean(z, axis=(0, 2, 3), keepdims=True)
        var = jnp.mean((z - mu) ** 2, axis=(0, 2, 3), keepdims=True)
        z = (z - mu) / jnp.sqrt(var + eps)
        z = z * gamma[l].reshape(1, d_chan, 1, 1) + beta[l].reshape(1, d_chan, 1, 1)
        y = jnp.maximum(z, 0.0)
    logits = (jnp.einsum("oi,nihw->nohw", wf.astype(jnp.float32), y)
              + bf.reshape(1, 1, 1, 1))
    return jax.nn.sigmoid(logits)


# --------------------------------- main ------------------------------------- #
if __name__ == "__main__":
    key = jax.random.PRNGKey(0)
    k_params, k_input = jax.random.split(key)

    D_CHAN = 16
    D_KERNEL_SIZE = 3
    D_N_LAYERS = 4            # -> 2 [1x1 conv, BN, ReLU] feature blocks

    params = make_discriminator_params(
        k_params, d_chan=D_CHAN, d_kernel_size=D_KERNEL_SIZE, d_n_layers=D_N_LAYERS)

    x = jax.random.normal(k_input, (2, 3, 16, 16), jnp.float32)   # NCHW like PyTorch

    args = (x, params["w1_mat"], params["b1"], params["fw"], params["fb"],
            params["gamma"], params["beta"], params["wf"], params["bf"])
    out = jax.block_until_ready(discriminator_forward(*args))

    ho = wo = 16 - D_KERNEL_SIZE + 1
    assert out.shape == (2, 1, ho, wo), out.shape
    assert bool(jnp.all(jnp.isfinite(out)))
    assert bool(jnp.all((out >= -1e-3) & (out <= 1.0 + 1e-3)))

    ref = discriminator_reference(*args)
    max_err = float(jnp.max(jnp.abs(out - ref)))
    assert max_err < 5e-2, max_err

    print("KERNEL_OK")
</pallas_src>

<mosaic_0001>
module attributes {stable_mosaic.version = 11 : i64} {
  func.func @discriminator_kernel(%arg0: memref<27x512xbf16, #tpu.memory_space<vmem>>, %arg1: memref<512x1xf32, #tpu.memory_space<vmem>>, %arg2: memref<16x27xbf16, #tpu.memory_space<vmem>>, %arg3: memref<16x1xf32, #tpu.memory_space<vmem>>, %arg4: memref<2x16x16xbf16, #tpu.memory_space<vmem>>, %arg5: memref<2x16x1xf32, #tpu.memory_space<vmem>>, %arg6: memref<2x16x1xf32, #tpu.memory_space<vmem>>, %arg7: memref<2x16x1xf32, #tpu.memory_space<vmem>>, %arg8: memref<1x16xbf16, #tpu.memory_space<vmem>>, %arg9: memref<1x1xf32, #tpu.memory_space<smem>>, %arg10: memref<1x512xf32, #tpu.memory_space<vmem>>) attributes {dimension_semantics = [], scalar_prefetch = 0 : i64, scratch_operands = 0 : i64, tpu.core_type = #tpu.core_type<tc>} {
    %c0 = arith.constant 0 : index
    %c0_0 = arith.constant 0 : index
    %0 = vector.load %arg1[%c0, %c0_0] : memref<512x1xf32, #tpu.memory_space<vmem>>, vector<512x1xf32>
    %c0_1 = arith.constant 0 : index
    %c0_2 = arith.constant 0 : index
    %1 = vector.load %arg2[%c0_1, %c0_2] : memref<16x27xbf16, #tpu.memory_space<vmem>>, vector<16x27xbf16>
    %c0_3 = arith.constant 0 : index
    %c0_4 = arith.constant 0 : index
    %2 = vector.load %arg0[%c0_3, %c0_4] : memref<27x512xbf16, #tpu.memory_space<vmem>>, vector<27x512xbf16>
    %cst = arith.constant dense<0.000000e+00> : vector<16x512xf32>
    %3 = tpu.matmul %1, %2, %cst {dimension_numbers = #tpu.dot_dimension_numbers<[1], [0], [0], [1], [0, 0, 1, 1], [], []>} : vector<16x27xbf16>, vector<27x512xbf16>, vector<16x512xf32> -> vector<16x512xf32>
    %c0_5 = arith.constant 0 : index
    %c0_6 = arith.constant 0 : index
    %4 = vector.load %arg3[%c0_5, %c0_6] : memref<16x1xf32, #tpu.memory_space<vmem>>, vector<16x1xf32>
    %5 = vector.broadcast %4 : vector<16x1xf32> to vector<16x512xf32>
    %6 = arith.addf %3, %5 : vector<16x512xf32>
    %7 = arith.truncf %6 : vector<16x512xf32> to vector<16x512xbf16>
    %c0_7 = arith.constant 0 : index
    %c0_8 = arith.constant 0 : index
    %c0_9 = arith.constant 0 : index
    %8 = vector.load %arg4[%c0_7, %c0_8, %c0_9] : memref<2x16x16xbf16, #tpu.memory_space<vmem>>, vector<1x16x16xbf16>
    %9 = vector.shape_cast %8 : vector<1x16x16xbf16> to vector<16x16xbf16>
    %cst_10 = arith.constant dense<0.000000e+00> : vector<16x512xf32>
    %10 = tpu.matmul %9, %7, %cst_10 {dimension_numbers = #tpu.dot_dimension_numbers<[1], [0], [0], [1], [0, 0, 1, 1], [], []>} : vector<16x16xbf16>, vector<16x512xbf16>, vector<16x512xf32> -> vector<16x512xf32>
    %c0_11 = arith.constant 0 : index
    %c0_12 = arith.constant 0 : index
    %c0_13 = arith.constant 0 : index
    %11 = vector.load %arg5[%c0_11, %c0_12, %c0_13] : memref<2x16x1xf32, #tpu.memory_space<vmem>>, vector<1x16x1xf32>
    %12 = vector.shape_cast %11 : vector<1x16x1xf32> to vector<16x1xf32>
    %13 = vector.broadcast %12 : vector<16x1xf32> to vector<16x512xf32>
    %14 = arith.addf %10, %13 : vector<16x512xf32>
    %15 = arith.mulf %14, %14 : vector<16x512xf32>
    %16 = tpu.concatenate %14, %15 in 0 : vector<16x512xf32>, vector<16x512xf32> -> vector<32x512xf32>
    %cst_14 = arith.constant dense<0.000000e+00> : vector<32x1xf32>
    %17 = tpu.matmul %16, %0, %cst_14 {dimension_numbers = #tpu.dot_dimension_numbers<[1], [0], [0], [1], [0, 0, 1, 1], [], []>} : vector<32x512xf32>, vector<512x1xf32>, vector<32x1xf32> -> vector<32x1xf32>
    %18 = vector.extract_strided_slice %17 {offsets = [0, 0], sizes = [16, 1], strides = [1, 1]} : vector<32x1xf32> to vector<16x1xf32>
    %cst_15 = arith.constant 0.00255102036 : f32
    %19 = vector.broadcast %cst_15 : f32 to vector<16x1xf32>
    %20 = arith.mulf %18, %19 : vector<16x1xf32>
    %21 = vector.extract_strided_slice %17 {offsets = [16, 0], sizes = [16, 1], strides = [1, 1]} : vector<32x1xf32> to vector<16x1xf32>
    %cst_16 = arith.constant 0.00255102036 : f32
    %22 = vector.broadcast %cst_16 : f32 to vector<16x1xf32>
    %23 = arith.mulf %21, %22 : vector<16x1xf32>
    %24 = arith.mulf %20, %20 : vector<16x1xf32>
    %25 = arith.subf %23, %24 : vector<16x1xf32>
    %cst_17 = arith.constant 0.000000e+00 : f32
    %26 = vector.broadcast %cst_17 : f32 to vector<16x1xf32>
    %27 = arith.maximumf %25, %26 : vector<16x1xf32>
    %28 = vector.broadcast %20 : vector<16x1xf32> to vector<16x512xf32>
    %29 = arith.subf %14, %28 : vector<16x512xf32>
    %cst_18 = arith.constant 9.99999974E-6 : f32
    %30 = vector.broadcast %cst_18 : f32 to vector<16x1xf32>
    %31 = arith.addf %27, %30 : vector<16x1xf32>
    %32 = math.rsqrt %31 : vector<16x1xf32>
    %33 = vector.broadcast %32 : vector<16x1xf32> to vector<16x512xf32>
    %34 = arith.mulf %29, %33 : vector<16x512xf32>
    %c0_19 = arith.constant 0 : index
    %c0_20 = arith.constant 0 : index
    %c0_21 = arith.constant 0 : index
    %35 = vector.load %arg6[%c0_19, %c0_20, %c0_21] : memref<2x16x1xf32, #tpu.memory_space<vmem>>, vector<1x16x1xf32>
    %36 = vector.shape_cast %35 : vector<1x16x1xf32> to vector<16x1xf32>
    %37 = vector.broadcast %36 : vector<16x1xf32> to vector<16x512xf32>
    %38 = arith.mulf %34, %37 : vector<16x512xf32>
    %c0_22 = arith.constant 0 : index
    %c0_23 = arith.constant 0 : index
    %c0_24 = arith.constant 0 : index
    %39 = vector.load %arg7[%c0_22, %c0_23, %c0_24] : memref<2x16x1xf32, #tpu.memory_space<vmem>>, vector<1x16x1xf32>
    %40 = vector.shape_cast %39 : vector<1x16x1xf32> to vector<16x1xf32>
    %41 = vector.broadcast %40 : vector<16x1xf32> to vector<16x512xf32>
    %42 = arith.addf %38, %41 : vector<16x512xf32>
    %cst_25 = arith.constant 0.000000e+00 : f32
    %43 = vector.broadcast %cst_25 : f32 to vector<16x512xf32>
    %44 = arith.maximumf %42, %43 : vector<16x512xf32>
    %45 = arith.truncf %44 : vector<16x512xf32> to vector<16x512xbf16>
    %c1 = arith.constant 1 : index
    %c0_26 = arith.constant 0 : index
    %c0_27 = arith.constant 0 : index
    %46 = vector.load %arg4[%c1, %c0_26, %c0_27] : memref<2x16x16xbf16, #tpu.memory_space<vmem>>, vector<1x16x16xbf16>
    %47 = vector.shape_cast %46 : vector<1x16x16xbf16> to vector<16x16xbf16>
    %cst_28 = arith.constant dense<0.000000e+00> : vector<16x512xf32>
    %48 = tpu.matmul %47, %45, %cst_28 {dimension_numbers = #tpu.dot_dimension_numbers<[1], [0], [0], [1], [0, 0, 1, 1], [], []>} : vector<16x16xbf16>, vector<16x512xbf16>, vector<16x512xf32> -> vector<16x512xf32>
    %c1_29 = arith.constant 1 : index
    %c0_30 = arith.constant 0 : index
    %c0_31 = arith.constant 0 : index
    %49 = vector.load %arg5[%c1_29, %c0_30, %c0_31] : memref<2x16x1xf32, #tpu.memory_space<vmem>>, vector<1x16x1xf32>
    %50 = vector.shape_cast %49 : vector<1x16x1xf32> to vector<16x1xf32>
    %51 = vector.broadcast %50 : vector<16x1xf32> to vector<16x512xf32>
    %52 = arith.addf %48, %51 : vector<16x512xf32>
    %53 = arith.mulf %52, %52 : vector<16x512xf32>
    %54 = tpu.concatenate %52, %53 in 0 : vector<16x512xf32>, vector<16x512xf32> -> vector<32x512xf32>
    %cst_32 = arith.constant dense<0.000000e+00> : vector<32x1xf32>
    %55 = tpu.matmul %54, %0, %cst_32 {dimension_numbers = #tpu.dot_dimension_numbers<[1], [0], [0], [1], [0, 0, 1, 1], [], []>} : vector<32x512xf32>, vector<512x1xf32>, vector<32x1xf32> -> vector<32x1xf32>
    %56 = vector.extract_strided_slice %55 {offsets = [0, 0], sizes = [16, 1], strides = [1, 1]} : vector<32x1xf32> to vector<16x1xf32>
    %cst_33 = arith.constant 0.00255102036 : f32
    %57 = vector.broadcast %cst_33 : f32 to vector<16x1xf32>
    %58 = arith.mulf %56, %57 : vector<16x1xf32>
    %59 = vector.extract_strided_slice %55 {offsets = [16, 0], sizes = [16, 1], strides = [1, 1]} : vector<32x1xf32> to vector<16x1xf32>
    %cst_34 = arith.constant 0.00255102036 : f32
    %60 = vector.broadcast %cst_34 : f32 to vector<16x1xf32>
    %61 = arith.mulf %59, %60 : vector<16x1xf32>
    %62 = arith.mulf %58, %58 : vector<16x1xf32>
    %63 = arith.subf %61, %62 : vector<16x1xf32>
    %cst_35 = arith.constant 0.000000e+00 : f32
    %64 = vector.broadcast %cst_35 : f32 to vector<16x1xf32>
    %65 = arith.maximumf %63, %64 : vector<16x1xf32>
    %66 = vector.broadcast %58 : vector<16x1xf32> to vector<16x512xf32>
    %67 = arith.subf %52, %66 : vector<16x512xf32>
    %cst_36 = arith.constant 9.99999974E-6 : f32
    %68 = vector.broadcast %cst_36 : f32 to vector<16x1xf32>
    %69 = arith.addf %65, %68 : vector<16x1xf32>
    %70 = math.rsqrt %69 : vector<16x1xf32>
    %71 = vector.broadcast %70 : vector<16x1xf32> to vector<16x512xf32>
    %72 = arith.mulf %67, %71 : vector<16x512xf32>
    %c1_37 = arith.constant 1 : index
    %c0_38 = arith.constant 0 : index
    %c0_39 = arith.constant 0 : index
    %73 = vector.load %arg6[%c1_37, %c0_38, %c0_39] : memref<2x16x1xf32, #tpu.memory_space<vmem>>, vector<1x16x1xf32>
    %74 = vector.shape_cast %73 : vector<1x16x1xf32> to vector<16x1xf32>
    %75 = vector.broadcast %74 : vector<16x1xf32> to vector<16x512xf32>
    %76 = arith.mulf %72, %75 : vector<16x512xf32>
    %c1_40 = arith.constant 1 : index
    %c0_41 = arith.constant 0 : index
    %c0_42 = arith.constant 0 : index
    %77 = vector.load %arg7[%c1_40, %c0_41, %c0_42] : memref<2x16x1xf32, #tpu.memory_space<vmem>>, vector<1x16x1xf32>
    %78 = vector.shape_cast %77 : vector<1x16x1xf32> to vector<16x1xf32>
    %79 = vector.broadcast %78 : vector<16x1xf32> to vector<16x512xf32>
    %80 = arith.addf %76, %79 : vector<16x512xf32>
    %cst_43 = arith.constant 0.000000e+00 : f32
    %81 = vector.broadcast %cst_43 : f32 to vector<16x512xf32>
    %82 = arith.maximumf %80, %81 : vector<16x512xf32>
    %83 = arith.truncf %82 : vector<16x512xf32> to vector<16x512xbf16>
    %c0_44 = arith.constant 0 : index
    %c0_45 = arith.constant 0 : index
    %84 = vector.load %arg8[%c0_44, %c0_45] : memref<1x16xbf16, #tpu.memory_space<vmem>>, vector<1x16xbf16>
    %cst_46 = arith.constant dense<0.000000e+00> : vector<1x512xf32>
    %85 = tpu.matmul %84, %83, %cst_46 {dimension_numbers = #tpu.dot_dimension_numbers<[1], [0], [0], [1], [0, 0, 1, 1], [], []>} : vector<1x16xbf16>, vector<16x512xbf16>, vector<1x512xf32> -> vector<1x512xf32>
    %c0_47 = arith.constant 0 : index
    %c0_48 = arith.constant 0 : index
    %86 = memref.load %arg9[%c0_47, %c0_48] : memref<1x1xf32, #tpu.memory_space<smem>>
    %87 = vector.broadcast %86 : f32 to vector<1x512xf32>
    %88 = arith.addf %85, %87 : vector<1x512xf32>
    %cst_49 = arith.constant 0.000000e+00 : f32
    %89 = vector.broadcast %cst_49 : f32 to vector<1x512xf32>
    %90 = arith.subf %89, %88 : vector<1x512xf32>
    %91 = math.exp %90 : vector<1x512xf32>
    %cst_50 = arith.constant 1.000000e+00 : f32
    %92 = vector.broadcast %cst_50 : f32 to vector<1x512xf32>
    %93 = arith.addf %92, %91 : vector<1x512xf32>
    %94 = tpu.reciprocal %93 {approx = true} : vector<1x512xf32> -> vector<1x512xf32>
    %c0_51 = arith.constant 0 : index
    %c0_52 = arith.constant 0 : index
    %95 = vector.load %arg10[%c0_51, %c0_52] : memref<1x512xf32, #tpu.memory_space<vmem>>, vector<1x512xf32>
    tpu.vector_store %arg10[%c0_51, %c0_52], %94 {strides = array<i32>} : memref<1x512xf32, #tpu.memory_space<vmem>>, vector<1x512xf32>,
    return
  }
}

</mosaic_0001>

<bundles_post_ra>
// kernel: squeeze.1
= control target key start
LH: loop header
LB: loop body
LE: loop exit
PB: predicated region body
PF: predicated region fallthrough
CT: control target
= control target key end

     0   :  { %s66_s8 = smov 80   ;;  %vm7_vm0 = vcmask 130048   ;;  %s67_s11 = smov 96   ;;  %s117_s0 = inlined_call_operand.vmem [shape: f32[512], index: 0, kind: input, shape index: {}]   ;;  %s118_s1 = inlined_call_operand.vmem [shape: f32[2,16,16], index: 1, kind: output, shape index: {}]  }
   0x1   :  { %v4_v0 = vld [vmem:[%s117_s0] sm:$0xf]  ;;  %s65_s0 = smov 112   ;;  %s68_s12 = smov 64  }
   0x2   :  { %5 = vst [vmem:[#allocation0] sm:$0xf] %v4_v0  ;;  %s69_s13 = smov 48   ;;  %s70_s14 = smov 32  }
   0x3   :  { %s71_s15 = smov 16  }
   0x9   :  { %v9_v1 = vld [vmem:[#allocation0] sm:$0xf]  }
   0xa   :  { %v21_v2 = vld [vmem:[#allocation0] sm:$0xf]   ;;  %10 = vrot.lane.b32.xlu0 %v9_v1, %s65_s0 }
   0xb   :  { %22 = vrot.lane.b32.xlu1 %v21_v2, %s66_s8  ;;  %v15_v3 = vld [vmem:[#allocation0] sm:$0xf]  }
   0xc   :  { %v27_v4 = vld [vmem:[#allocation0] sm:$0xf]  }
   0xd   :  { %v6_v5 = vld [vmem:[#allocation0] sm:$0xf]  }
   0xe   :  { %8 = vst.msk [vmem:[%s118_s1] ss:$8 sm:$0xf] %vm7_vm0, %v6_v5   ;;  %16 = vrot.lane.b32.xlu0 %v15_v3, %s67_s11  ;;  %v33_v6 = vld [vmem:[#allocation0] sm:$0xf]  }
   0xf   :  { %28 = vrot.lane.b32.xlu1 %v27_v4, %s68_s12  ;;  %v39_v7 = vld [vmem:[#allocation0] sm:$0xf]  }
  0x10   :  { %v45_v8 = vld [vmem:[#allocation0] sm:$0xf]  }
  0x12   :  { %34 = vrot.lane.b32.xlu0 %v33_v6, %s69_s13 }
  0x13   :  { %40 = vrot.lane.b32.xlu1 %v39_v7, %s70_s14 }
  0x16   :  { %46 = vrot.lane.b32.xlu0 %v45_v8, %s71_s15 }
  0x7c   :  { %v11_v9 = vpop.permute.xlu0 %10  }
  0x7d   :  { %v23_v10 = vpop.permute.xlu1 %22   ;;  %51 = vst.msk [vmem:[%s118_s1 + $0x1] ss:$8 sm:$0xf] %vm7_vm0, %v11_v9  }
  0x7e   :  { %53 = vst.msk [vmem:[%s118_s1 + $0x3] ss:$8 sm:$0xf] %vm7_vm0, %v23_v10  }
  0x80   :  { %v17_v11 = vpop.permute.xlu0 %16  }
  0x81   :  { %v29_v12 = vpop.permute.xlu1 %28   ;;  %52 = vst.msk [vmem:[%s118_s1 + $0x2] ss:$8 sm:$0xf] %vm7_vm0, %v17_v11  }
  0x82   :  { %54 = vst.msk [vmem:[%s118_s1 + $0x4] ss:$8 sm:$0xf] %vm7_vm0, %v29_v12  }
  0x84   :  { %v35_v13 = vpop.permute.xlu0 %34  }
  0x85   :  { %v41_v14 = vpop.permute.xlu1 %40   ;;  %55 = vst.msk [vmem:[%s118_s1 + $0x5] ss:$8 sm:$0xf] %vm7_vm0, %v35_v13  }
  0x86   :  { %56 = vst.msk [vmem:[%s118_s1 + $0x6] ss:$8 sm:$0xf] %vm7_vm0, %v41_v14  }
  0x88   :  { %v47_v15 = vpop.permute.xlu0 %46  }
  0x89   :  { %57 = vst.msk [vmem:[%s118_s1 + $0x7] ss:$8 sm:$0xf] %vm7_vm0, %v47_v15  }

// kernel: discriminator_forward.1
= control target key start
LH: loop header
LB: loop body
LE: loop exit
PB: predicated region body
PF: predicated region fallthrough
CT: control target
= control target key end

     0   :  { %vm168_vm0 = vcmask 1044480   ;;  %vm169_vm1 = vcmask 1045504   ;;  %v1576_v1 = vmov 65535   ;;  %v2161_v3 = vmov 0   ;;  %s2150_s0 = inlined_call_operand.vmem [shape: bf16[27,512], index: 0, kind: input, shape index: {}]   ;;  %s2151_s3 = inlined_call_operand.vmem [shape: f32[16,1], index: 3, kind: input, shape index: {}]   ;;  %s2152_s2 = inlined_call_operand.vmem [shape: bf16[16,27], index: 2, kind: input, shape index: {}]   ;;  %s2153_s6 = inlined_call_operand.vmem [shape: f32[2,16,1], index: 6, kind: input, shape index: {}]   ;;  %s2154_s4 = inlined_call_operand.vmem [shape: bf16[2,16,16], index: 4, kind: input, shape index: {}]   ;;  %s2155_s5 = inlined_call_operand.vmem [shape: f32[2,16,1], index: 5, kind: input, shape index: {}]   ;;  %s2156_s1 = inlined_call_operand.vmem [shape: f32[512,1], index: 1, kind: input, shape index: {}]   ;;  %s2157_s7 = inlined_call_operand.vmem [shape: f32[2,16,1], index: 7, kind: input, shape index: {}]   ;;  %s2158_s8 = inlined_call_operand.vmem [shape: bf16[1,16], index: 8, kind: input, shape index: {}]   ;;  %s2159_s9 = inlined_call_operand.<no memory space> [shape: f32[1,1], index: 9, kind: input, shape index: {}]   ;;  %s2160_s10 = inlined_call_operand.vmem [shape: f32[1,512], index: 10, kind: output, shape index: {}]  }
   0x1   :  { %v1537_v0 = vld [vmem:[%s2150_s0 + $0x4] ss:$16 sps:$4 sm:$0xff]   ;;  %v170_v2 = vsel %vm168_vm0, 4294967295, %v1576_v1  ;;  %216 = vmatprep.mubr.bf16.mxu0 %v2161_v3  ;;  %259 = vmatprep.mubr.bf16.mxu1 %v2161_v3  ;;  %v1539_v4 = vld [vmem:[%s2150_s0 + $0xc] ss:$16 sps:$4 sm:$0xff]   ;;  %vm164_vm2 = vcmask 220160  }
   0x2   :  { %1535 = vset.pattern.permute.xlu0 %v2161_v3  ;;  %1536 = vset.pattern.permute.xlu1 %v2161_v3  ;;  %v1541_v5 = vld [vmem:[%s2150_s0] ss:$16 sps:$4 sm:$0xff]   ;;  %v1542_v6 = vld [vmem:[%s2150_s0 + $0x8] ss:$16 sps:$4 sm:$0xff]   ;;  %v171_v7 = vsel %vm169_vm1, %v170_v2, 0  ;;  %vm293_vm3 = vcmask 130048  }
   0x3   :  { %184 = vmatprep.subr.bf16.mxu0 %v1537_v0  ;;  %227 = vmatprep.subr.bf16.mxu1 %v1539_v4  ;;  %v1543_v8 = vld [vmem:[%s2150_s0 + $0x24] ss:$16 sps:$4 sm:$0x3f]   ;;  %v1545_v9 = vld [vmem:[%s2150_s0 + $0x2c] ss:$16 sps:$4 sm:$0x3f]  }
   0x4   :  { %185 = vmatpush1.bf16.msra.mxu0 %v1541_v5  ;;  %228 = vmatpush1.bf16.msra.mxu1 %v1542_v6  ;;  %v176_v10 = vand.u32 %v1543_v8, %v171_v7  ;;  %v1547_v11 = vld [vmem:[%s2150_s0 + $0x20] ss:$16 sps:$4 sm:$0x3f]   ;;  %v1548_v12 = vld [vmem:[%s2150_s0 + $0x28] ss:$16 sps:$4 sm:$0x3f]   ;;  %v182_v13 = vand.u32 %v1545_v9, %v171_v7 }
   0x5   :  { %v111_v14 = vld [vmem:[%s2151_s3] sm:$0xff]  ;;  %v173_v15 = vand.u32 %v1547_v11, %v171_v7  ;;  %v179_v16 = vand.u32 %v1548_v12, %v171_v7  ;;  %v112_v18 = vld [vmem:[%s2151_s3 + $0x8] sm:$0xff]  ;;  %v55_v55 = vld [vmem:[%s2156_s1 + $0x90] sm:$0xff] }
   0x6   :  { %186 = vmatprep.subr.bf16.mxu0 %v176_v10  ;;  %115 = vperm.xlu0 %1535, %v111_v14   ;;  %v1549_v17 = vld [vmem:[%s2152_s2] sm:$0xff]   ;;  %v277_v21 = vld [vmem:[%s2155_s5 + $0x8] sm:$0xff]  ;;  %v56_v56 = vld [vmem:[%s2156_s1 + $0x98] sm:$0xff] }
   0x7   :  { %229 = vmatprep.subr.bf16.mxu1 %v182_v13  ;;  %v611_v19 = vld [vmem:[%s2153_s6] sm:$0xff]  ;;  %v612_v22 = vld [vmem:[%s2153_s6 + $0x8] sm:$0xff]  ;;  %v87_v57 = vld [vmem:[%s2156_s1 + $0x190] sm:$0xff]  ;;  %v1740_v0 = vpack.c.bf16 %v56_v56, %v55_v55 }
   0x8   :  { %187 = vmatpush1.bf16.msra.mxu0 %v173_v15  ;;  %230 = vmatpush1.bf16.msra.mxu1 %v179_v16  ;;  %v276_v20 = vld [vmem:[%s2155_s5] sm:$0xff]  ;;  %v54_v38 = vld [vmem:[%s2156_s1 + $0x88] sm:$0xff]  ;;  %v88_v58 = vld [vmem:[%s2156_s1 + $0x198] sm:$0xff] }
   0x9   :  { %280 = vperm.xlu1 %1536, %v276_v20   ;;  %v53_v31 = vld [vmem:[%s2156_s1 + $0x80] sm:$0xff]  ;;  %v86_v40 = vld [vmem:[%s2156_s1 + $0x188] sm:$0xff]  ;;  %v39_v62 = vld [vmem:[%s2156_s1 + $0x10] sm:$0xff]  ;;  %v1742_v1 = vpack.c.bf16 %v88_v58, %v87_v57 }
   0xa   :  { %120 = vperm.xlu0 %1535, %v112_v18   ;;  %v85_v39 = vld [vmem:[%s2156_s1 + $0x180] sm:$0xff]  ;;  %v38_v48 = vld [vmem:[%s2156_s1 + $0x8] sm:$0xff]  ;;  %v1703_v51 = vpack.c.bf16 %v54_v38, %v53_v31  ;;  %v40_v63 = vld [vmem:[%s2156_s1 + $0x18] sm:$0xff] }
   0xb   :  { %1210 = vmatmul.mubr.msk.bf16.vlgmr.msra.gmra.mrb[0].mxu0 %vm164_vm2, %v1549_v17  ;;  %1211 = vmatmul.mubr.msk.bf16.vlgmr.msra.gmra.mrb[0].mxu1 %vm164_vm2, %v1549_v17  ;;  %v37_v47 = vld [vmem:[%s2156_s1] sm:$0xff]  ;;  %v1705_v52 = vpack.c.bf16 %v86_v40, %v85_v39  ;;  %v70_v54 = vld [vmem:[%s2156_s1 + $0x108] sm:$0xff]  ;;  %v71_v2 = vld [vmem:[%s2156_s1 + $0x110] sm:$0xff]  ;;  %v1766_v9 = vpack.c.bf16 %v40_v63, %v39_v62 }
   0xc   :  { %329 = vmatprep.mubr.bf16.mxu0 %v2161_v3  ;;  %372 = vmatprep.mubr.bf16.mxu1 %v2161_v3  ;;  %v69_v53 = vld [vmem:[%s2156_s1 + $0x100] sm:$0xff]  ;;  %v1728_v60 = vpack.c.bf16 %v38_v48, %v37_v47  ;;  %v72_v4 = vld [vmem:[%s2156_s1 + $0x118] sm:$0xff]  ;;  %v58_v6 = vld [vmem:[%s2156_s1 + $0xa8] sm:$0xff] }
   0xd   :  { %285 = vperm.xlu1 %1536, %v277_v21   ;;  %v1550_v59 = vld [vmem:[%s2154_s4] sm:$0xff]   ;;  %v1730_v61 = vpack.c.bf16 %v70_v54, %v69_v53  ;;  %v90_v8 = vld [vmem:[%s2156_s1 + $0x1a8] sm:$0xff]  ;;  %v1768_v10 = vpack.c.bf16 %v72_v4, %v71_v2  ;;  %v59_v17 = vld [vmem:[%s2156_s1 + $0xb0] sm:$0xff] }
   0xe   :  { %615 = vperm.xlu0 %1535, %v611_v19   ;;  %v57_v5 = vld [vmem:[%s2156_s1 + $0xa0] sm:$0xff]  ;;  %v42_v12 = vld [vmem:[%s2156_s1 + $0x28] sm:$0xff]  ;;  %v60_v18 = vld [vmem:[%s2156_s1 + $0xb8] sm:$0xff] }
   0xf   :  { %v89_v7 = vld [vmem:[%s2156_s1 + $0x1a0] sm:$0xff]  ;;  %v1778_v13 = vpack.c.bf16 %v58_v6, %v57_v5  ;;  %v74_v16 = vld [vmem:[%s2156_s1 + $0x128] sm:$0xff]  ;;  %v91_v19 = vld [vmem:[%s2156_s1 + $0x1b0] sm:$0xff] }
  0x10   :  { %v41_v11 = vld [vmem:[%s2156_s1 + $0x20] sm:$0xff]  ;;  %v1780_v14 = vpack.c.bf16 %v90_v8, %v89_v7  ;;  %v92_v20 = vld [vmem:[%s2156_s1 + $0x1b8] sm:$0xff]  ;;  %v78_v40 = vld [vmem:[%s2156_s1 + $0x148] sm:$0xff] }
  0x11   :  { %620 = vperm.xlu1 %1536, %v612_v22   ;;  %v73_v15 = vld [vmem:[%s2156_s1 + $0x120] sm:$0xff]  ;;  %v1802_v21 = vpack.c.bf16 %v42_v12, %v41_v11  ;;  %v47_v47 = vld [vmem:[%s2156_s1 + $0x50] sm:$0xff]  ;;  %v48_v48 = vld [vmem:[%s2156_s1 + $0x58] sm:$0xff] }
  0x12   :  { %v1804_v22 = vpack.c.bf16 %v74_v16, %v73_v15  ;;  %v93_v31 = vld [vmem:[%s2156_s1 + $0x1c0] sm:$0xff]  ;;  %v79_v53 = vld [vmem:[%s2156_s1 + $0x150] sm:$0xff]  ;;  %v80_v54 = vld [vmem:[%s2156_s1 + $0x158] sm:$0xff] }
  0x13   :  { %v77_v39 = vld [vmem:[%s2156_s1 + $0x140] sm:$0xff]  ;;  %v66_v56 = vld [vmem:[%s2156_s1 + $0xe8] sm:$0xff]  ;;  %v1912_v62 = vpack.c.bf16 %v80_v54, %v79_v53  ;;  %v67_v12 = vld [vmem:[%s2156_s1 + $0xf0] sm:$0xff] }
  0x14   :  { %v65_v55 = vld [vmem:[%s2156_s1 + $0xe0] sm:$0xff]  ;;  %v98_v58 = vld [vmem:[%s2156_s1 + $0x1e8] sm:$0xff]  ;;  %v68_v15 = vld [vmem:[%s2156_s1 + $0xf8] sm:$0xff] }
  0x15   :  { %v97_v57 = vld [vmem:[%s2156_s1 + $0x1e0] sm:$0xff]  ;;  %v1919_v2 = vpack.c.bf16 %v66_v56, %v65_v55  ;;  %v50_v5 = vld [vmem:[%s2156_s1 + $0x68] sm:$0xff]  ;;  %v99_v16 = vld [vmem:[%s2156_s1 + $0x1f0] sm:$0xff] }
  0x16   :  { %v49_v63 = vld [vmem:[%s2156_s1 + $0x60] sm:$0xff]  ;;  %v1921_v4 = vpack.c.bf16 %v98_v58, %v97_v57  ;;  %v82_v7 = vld [vmem:[%s2156_s1 + $0x168] sm:$0xff] }
  0x17   :  { %v81_v6 = vld [vmem:[%s2156_s1 + $0x160] sm:$0xff]  ;;  %v1934_v8 = vpack.c.bf16 %v50_v5, %v49_v63 }
  0x18   :  { %v1936_v11 = vpack.c.bf16 %v82_v7, %v81_v6 }
  0x85   :  { %v116_v23 = vpop.permute.xlu0 %115 }
  0x89   :  { %v121_v24 = vpop.permute.xlu0 %120 }
  0xde   :  { %v218_v25 = vpop.f32.mrb[0].mxu0  ;;  %v261_v26 = vpop.f32.mrb[0].mxu1 }
  0xdf   :  { %v220_v27 = vpop.f32.mrb[1].mxu0  ;;  %v263_v28 = vpop.f32.mrb[1].mxu1  ;;  %v219_v32 = vadd.f32 %v218_v25, %v116_v23  ;;  %v262_v33 = vadd.f32 %v261_v26, %v116_v23  ;;  %v1814_v25 = vpack.c.bf16 %v60_v18, %v59_v17  ;;  %v1816_v26 = vpack.c.bf16 %v92_v20, %v91_v19  ;;  %v100_v18 = vld [vmem:[%s2156_s1 + $0x1f8] sm:$0xff]  ;;  %v51_v19 = vld [vmem:[%s2156_s1 + $0x70] sm:$0xff] }
  0xe0   :  { %v222_v29 = vpop.f32.mrb[2].mxu0  ;;  %v265_v30 = vpop.f32.mrb[2].mxu1  ;;  %v221_v41 = vadd.f32 %v220_v27, %v116_v23  ;;  %v264_v42 = vadd.f32 %v263_v28, %v116_v23  ;;  %v43_v23 = vld [vmem:[%s2156_s1 + $0x30] sm:$0xff]  ;;  %v76_v28 = vld [vmem:[%s2156_s1 + $0x138] sm:$0xff]  ;;  %v1951_v17 = vpack.c.bf16 %v68_v15, %v67_v12 }
  0xe1   :  { %v223_v34 = vadd.f32 %v222_v29, %v121_v24  ;;  %v266_v35 = vadd.f32 %v265_v30, %v121_v24  ;;  %v224_v36 = vpop.f32.mrb[3].mxu0  ;;  %v267_v37 = vpop.f32.mrb[3].mxu1  ;;  %v75_v27 = vld [vmem:[%s2156_s1 + $0x130] sm:$0xff]  ;;  %v61_v29 = vld [vmem:[%s2156_s1 + $0xc0] sm:$0xff]  ;;  %v62_v30 = vld [vmem:[%s2156_s1 + $0xc8] sm:$0xff] }
  0xe2   :  { %v225_v43 = vadd.f32 %v224_v36, %v121_v24  ;;  %v268_v44 = vadd.f32 %v267_v37, %v121_v24  ;;  %v44_v24 = vld [vmem:[%s2156_s1 + $0x38] sm:$0xff]  ;;  %v46_v36 = vld [vmem:[%s2156_s1 + $0x48] sm:$0xff]  ;;  %v1850_v37 = vpack.c.bf16 %v62_v30, %v61_v29  ;;  %v281_v30 = vpop.permute.xlu1 %280 }
  0xe3   :  { %v270_v45 = vpack.c.bf16 %v223_v34, %v219_v32  ;;  %v272_v46 = vpack.c.bf16 %v266_v35, %v262_v33  ;;  %v94_v32 = vld [vmem:[%s2156_s1 + $0x1c8] sm:$0xff]  ;;  %v1838_v33 = vpack.c.bf16 %v44_v24, %v43_v23  ;;  %v1840_v34 = vpack.c.bf16 %v76_v28, %v75_v27  ;;  %v45_v35 = vld [vmem:[%s2156_s1 + $0x40] sm:$0xff]  ;;  %v52_v20 = vld [vmem:[%s2156_s1 + $0x78] sm:$0xff] }
  0xe4   :  { %v271_v49 = vpack.c.bf16 %v225_v43, %v221_v41  ;;  %v273_v50 = vpack.c.bf16 %v268_v44, %v264_v42  ;;  %v1852_v38 = vpack.c.bf16 %v94_v32, %v93_v31  ;;  %v63_v41 = vld [vmem:[%s2156_s1 + $0xd0] sm:$0xff]  ;;  %v64_v42 = vld [vmem:[%s2156_s1 + $0xd8] sm:$0xff]  ;;  %v1962_v23 = vpack.c.bf16 %v100_v18, %v99_v16 }
  0xe5   :  { %v95_v43 = vld [vmem:[%s2156_s1 + $0x1d0] sm:$0xff]  ;;  %v96_v44 = vld [vmem:[%s2156_s1 + $0x1d8] sm:$0xff]  ;;  %v1964_v24 = vpack.c.bf16 %v52_v20, %v51_v19 }
  0xe6   :  { %297 = vmatprep.subr.bf16.mxu0 %v271_v49  ;;  %340 = vmatprep.subr.bf16.mxu1 %v273_v50  ;;  %v1886_v49 = vpack.c.bf16 %v64_v42, %v63_v41  ;;  %v1888_v50 = vpack.c.bf16 %v96_v44, %v95_v43  ;;  %v83_v27 = vld [vmem:[%s2156_s1 + $0x170] sm:$0xff]  ;;  %v84_v28 = vld [vmem:[%s2156_s1 + $0x178] sm:$0xff]  ;;  %v286_v31 = vpop.permute.xlu1 %285 }
  0xe7   :  { %298 = vmatpush1.bf16.msra.mxu0 %v270_v45  ;;  %341 = vmatpush1.bf16.msra.mxu1 %v272_v46  ;;  %v1874_v45 = vpack.c.bf16 %v46_v36, %v45_v35  ;;  %v1876_v46 = vpack.c.bf16 %v78_v40, %v77_v39  ;;  %v1973_v29 = vpack.c.bf16 %v84_v28, %v83_v27 }
  0xe8   :  { %1405 = vmatprep.subr.bf16.mxu0 %v1703_v51  ;;  %1437 = vmatprep.subr.bf16.mxu1 %v1705_v52 }
  0xe9   :  { %2164 = vst [vmem:[#allocation3_spill] sm:$0xff] %v1973_v29 }
  0xea   :  { %1213 = vmatmul.mubr.msk.bf16.vlgmr.msra.gmra.mrb[4].mxu0 %vm293_vm3, %v1550_v59  ;;  %1214 = vmatmul.mubr.msk.bf16.vlgmr.msra.gmra.mrb[4].mxu1 %vm293_vm3, %v1550_v59  ;;  %v1910_v59 = vpack.c.bf16 %v48_v48, %v47_v47 }
  0xeb   :  { %1407 = vmatpush3.bf16.msra.mxu0 %v1728_v60  ;;  %1439 = vmatpush3.bf16.msra.mxu1 %v1730_v61 }
  0xec   :  { %1409 = vmatprep.subr.bf16.mxu0 %v1740_v0  ;;  %1441 = vmatprep.subr.bf16.mxu1 %v1742_v1 }
  0xef   :  { %1411 = vmatpush3.bf16.msra.mxu0 %v1766_v9  ;;  %1443 = vmatpush3.bf16.msra.mxu1 %v1768_v10 }
  0xf0   :  { %1413 = vmatprep.subr.bf16.mxu0 %v1778_v13  ;;  %1445 = vmatprep.subr.bf16.mxu1 %v1780_v14 }
  0xf3   :  { %1415 = vmatpush3.bf16.msra.mxu0 %v1802_v21  ;;  %1447 = vmatpush3.bf16.msra.mxu1 %v1804_v22 }
  0xf4   :  { %1417 = vmatprep.subr.bf16.mxu0 %v1814_v25  ;;  %1449 = vmatprep.subr.bf16.mxu1 %v1816_v26 }
  0xf7   :  { %1419 = vmatpush3.bf16.msra.mxu0 %v1838_v33  ;;  %1451 = vmatpush3.bf16.msra.mxu1 %v1840_v34 }
  0xf8   :  { %1421 = vmatprep.subr.bf16.mxu0 %v1850_v37  ;;  %1453 = vmatprep.subr.bf16.mxu1 %v1852_v38 }
  0xfb   :  { %1423 = vmatpush3.bf16.msra.mxu0 %v1874_v45  ;;  %1455 = vmatpush3.bf16.msra.mxu1 %v1876_v46 }
  0xfc   :  { %1425 = vmatprep.subr.bf16.mxu0 %v1886_v49  ;;  %1457 = vmatprep.subr.bf16.mxu1 %v1888_v50 }
  0xff   :  { %1427 = vmatpush3.bf16.msra.mxu0 %v1910_v59  ;;  %1459 = vmatpush3.bf16.msra.mxu1 %v1912_v62 }
 0x100   :  { %1429 = vmatprep.subr.bf16.mxu0 %v1919_v2  ;;  %1461 = vmatprep.subr.bf16.mxu1 %v1921_v4 }
 0x103   :  { %1431 = vmatpush3.bf16.msra.mxu0 %v1934_v8  ;;  %1463 = vmatpush3.bf16.msra.mxu1 %v1936_v11 }
 0x104   :  { %1433 = vmatprep.subr.bf16.mxu0 %v1951_v17  ;;  %1465 = vmatprep.subr.bf16.mxu1 %v1962_v23 }
 0x107   :  { %1435 = vmatpush3.bf16.msra.mxu0 %v1964_v24  ;;  %1467 = vmatpush3.bf16.msra.mxu1 %v1973_v29 }
 0x1bd   :  { %v331_v32 = vpop.f32.mrb[4].mxu0  ;;  %v374_v35 = vpop.f32.mrb[4].mxu1 }
 0x1be   :  { %v333_v36 = vpop.f32.mrb[5].mxu0  ;;  %v376_v39 = vpop.f32.mrb[5].mxu1  ;;  %v1982_v44 = vadd.f32 %v331_v32, %v281_v30  ;;  %v1984_v47 = vadd.f32 %v374_v35, %v281_v30 }
 0x1bf   :  { %v1978_v40 = vadd.f32 %v333_v36, %v281_v30  ;;  %v1980_v41 = vadd.f32 %v376_v39, %v281_v30  ;;  %v335_v42 = vpop.f32.mrb[6].mxu0  ;;  %v378_v43 = vpop.f32.mrb[6].mxu1 }
 0x1c0   :  { %v337_v48 = vpop.f32.mrb[7].mxu0  ;;  %v380_v53 = vpop.f32.mrb[7].mxu1  ;;  %v1996_v56 = vadd.f32 %v335_v42, %v286_v31  ;;  %v1998_v57 = vadd.f32 %v378_v43, %v286_v31  ;;  %v383_v5 = vmul.f32 %v1982_v44, %v1982_v44  ;;  %v385_v6 = vmul.f32 %v1984_v47, %v1984_v47 }
 0x1c1   :  { %v1986_v54 = vadd.f32 %v337_v48, %v286_v31  ;;  %v1988_v55 = vadd.f32 %v380_v53, %v286_v31  ;;  %455 = vmatprep.mubr.f32.mxu0 %v1978_v40  ;;  %540 = vmatprep.mubr.f32.mxu1 %v1980_v41  ;;  %v384_v58 = vmul.f32 %v1978_v40, %v1978_v40 }
 0x1c2   :  { %456 = vmatmul.mubr.f32.vlgmr.msra.gmra.mrb[8].mxu0 %v1982_v44  ;;  %541 = vmatmul.mubr.f32.vlgmr.msra.gmra.mrb[8].mxu1 %v1984_v47  ;;  %v386_v63 = vmul.f32 %v1980_v41, %v1980_v41  ;;  %v387_v15 = vmul.f32 %v1996_v56, %v1996_v56  ;;  %v389_v16 = vmul.f32 %v1998_v57, %v1998_v57 }
 0x1c3   :  { %460 = vmatprep.mubr.f32.mxu0 %v1986_v54  ;;  %545 = vmatprep.mubr.f32.mxu1 %v1988_v55  ;;  %v388_v7 = vmul.f32 %v1986_v54, %v1986_v54  ;;  %v390_v12 = vmul.f32 %v1988_v55, %v1988_v55 }
 0x1c6   :  { %461 = vmatmul.mubr.f32.gmra.mrb[10].mxu0 %v1996_v56  ;;  %546 = vmatmul.mubr.f32.gmra.mrb[10].mxu1 %v1998_v57 }
 0x1c7   :  { %465 = vmatprep.mubr.f32.mxu0 %v384_v58  ;;  %550 = vmatprep.mubr.f32.mxu1 %v386_v63 }
 0x1ca   :  { %466 = vmatmul.mubr.f32.gmra.mrb[12].mxu0 %v383_v5  ;;  %551 = vmatmul.mubr.f32.gmra.mrb[12].mxu1 %v385_v6 }
 0x1cb   :  { %470 = vmatprep.mubr.f32.mxu0 %v388_v7  ;;  %555 = vmatprep.mubr.f32.mxu1 %v390_v12 }
 0x1ce   :  { %471 = vmatmul.mubr.f32.gmra.mrb[14].mxu0 %v387_v15  ;;  %556 = vmatmul.mubr.f32.gmra.mrb[14].mxu1 %v389_v16 }
 0x1cf   :  { %719 = vmatprep.mubr.bf16.mxu0 %v2161_v3  ;;  %762 = vmatprep.mubr.bf16.mxu1 %v2161_v3 }
 0x295   :  { %v1260_v18 = vpop.f32.mrb[8].mxu0  ;;  %v1304_v19 = vpop.f32.mrb[8].mxu1 }
 0x296   :  { %v1261_v20 = vpop.f32.mrb[9].mxu0  ;;  %v1305_v27 = vpop.f32.mrb[9].mxu1 }
 0x297   :  { %v1262_v28 = vadd.f32 %v1261_v20, %v1260_v18  ;;  %v1306_v30 = vadd.f32 %v1305_v27, %v1304_v19 }
 0x299   :  { %v543_v31 = vadd.f32 %v1306_v30, %v1262_v28  ;;  %v1263_v32 = vpop.f32.mrb[10].mxu0  ;;  %v1307_v35 = vpop.f32.mrb[10].mxu1 }
 0x29a   :  { %v1264_v36 = vpop.f32.mrb[11].mxu0  ;;  %v1308_v39 = vpop.f32.mrb[11].mxu1 }
 0x29b   :  { %v561_v42 = vmul.f32 0.0025510204, %v543_v31  ;;  %v1265_v43 = vadd.f32 %v1264_v36, %v1263_v32  ;;  %v1309_v48 = vadd.f32 %v1308_v39, %v1307_v35 }
 0x29d   :  { %v548_v53 = vadd.f32 %v1309_v48, %v1265_v43  ;;  %v1310_v58 = vpop.f32.mrb[12].mxu1  ;;  %573 = vperm.xlu0 %1535, %v561_v42   ;;  %v1266_v63 = vpop.f32.mrb[12].mxu0  ;;  %v565_v28 = vmul.f32 %v561_v42, %v561_v42  ;;  %v631_v42 = vld [vmem:[%s2157_s7] sm:$0xff] }
 0x29e   :  { %v1267_v5 = vpop.f32.mrb[13].mxu0  ;;  %v1311_v6 = vpop.f32.mrb[13].mxu1 }
 0x29f   :  { %v562_v7 = vmul.f32 0.0025510204, %v548_v53  ;;  %v1268_v12 = vadd.f32 %v1267_v5, %v1266_v63  ;;  %v1312_v15 = vadd.f32 %v1311_v6, %v1310_v58  ;;  %v632_v6 = vld [vmem:[%s2157_s7 + $0x8] sm:$0xff] }
 0x2a1   :  { %v553_v16 = vadd.f32 %v1312_v15, %v1268_v12  ;;  %v1313_v18 = vpop.f32.mrb[14].mxu1  ;;  %578 = vperm.xlu1 %1536, %v562_v7   ;;  %v1269_v19 = vpop.f32.mrb[14].mxu0  ;;  %v566_v39 = vmul.f32 %v562_v7, %v562_v7  ;;  %v1222_v7 = vld [vmem:[%s2153_s6 + $0x10] sm:$0xff]  ;;  %v1223_v12 = vld [vmem:[%s2153_s6 + $0x18] sm:$0xff] }
 0x2a2   :  { %v1270_v20 = vpop.f32.mrb[15].mxu0  ;;  %v1314_v27 = vpop.f32.mrb[15].mxu1 }
 0x2a3   :  { %v563_v30 = vmul.f32 0.0025510204, %v553_v16  ;;  %v1271_v31 = vadd.f32 %v1270_v20, %v1269_v19  ;;  %v1315_v32 = vadd.f32 %v1314_v27, %v1313_v18  ;;  %v616_v15 = vpop.permute.xlu0 %615  ;;  %v621_v16 = vpop.permute.xlu1 %620 }
 0x2a5   :  { %v567_v35 = vsub.f32 %v563_v30, %v565_v28  ;;  %v558_v36 = vadd.f32 %v1315_v32, %v1271_v31 }
 0x2a7   :  { %v569_v43 = vmax.f32 %v567_v35, 0.0  ;;  %v564_v48 = vmul.f32 0.0025510204, %v558_v36 }
 0x2a9   :  { %v589_v3 = vadd.f32 1e-05, %v569_v43  ;;  %v568_v29 = vsub.f32 %v564_v48, %v566_v39 }
 0x2ab   :  { %1552 = vrsqrt.f32 %v589_v3  ;;  %v570_v53 = vmax.f32 %v568_v29, 0.0  ;;  %v1217_v3 = vld [vmem:[%s2155_s5 + $0x10] sm:$0xff]  ;;  %v1218_v29 = vld [vmem:[%s2155_s5 + $0x18] sm:$0xff] }
 0x2ad   :  { %v590_v58 = vadd.f32 1e-05, %v570_v53 }
 0x2af   :  { %1554 = vrsqrt.f32 %v590_v58 }
 0x2b5   :  { %v1553_v63 = vpop.eup %1552 }
 0x2b6   :  { %595 = vperm.xlu0 %1535, %v1553_v63  }
 0x2b9   :  { %v1555_v5 = vpop.eup %1554 }
 0x2ba   :  { %600 = vperm.xlu1 %1536, %v1555_v5   ;;  %635 = vperm.xlu0 %1535, %v631_v42  }
 0x2be   :  { %640 = vperm.xlu1 %1536, %v632_v6   ;;  %671 = vperm.xlu0 %1535, %v1217_v3  }
 0x2c2   :  { %676 = vperm.xlu1 %1536, %v1218_v29   ;;  %1006 = vperm.xlu0 %1535, %v1222_v7  }
 0x2c6   :  { %1011 = vperm.xlu1 %1536, %v1223_v12  }
 0x31c   :  { %v574_v18 = vpop.permute.xlu0 %573 }
 0x31d   :  { %v581_v19 = vsub.f32 %v1982_v44, %v574_v18  ;;  %v582_v20 = vsub.f32 %v1978_v40, %v574_v18  ;;  %v583_v27 = vsub.f32 %v1984_v47, %v574_v18  ;;  %v584_v28 = vsub.f32 %v1980_v41, %v574_v18 }
 0x320   :  { %v579_v30 = vpop.permute.xlu1 %578 }
 0x321   :  { %v585_v43 = vsub.f32 %v1996_v56, %v579_v30  ;;  %v586_v48 = vsub.f32 %v1986_v54, %v579_v30  ;;  %v587_v53 = vsub.f32 %v1998_v57, %v579_v30  ;;  %v588_v44 = vsub.f32 %v1988_v55, %v579_v30 }
 0x335   :  { %v596_v31 = vpop.permute.xlu0 %595 }
 0x336   :  { %v603_v32 = vmul.f32 %v596_v31, %v581_v19  ;;  %v604_v35 = vmul.f32 %v596_v31, %v582_v20  ;;  %v605_v36 = vmul.f32 %v596_v31, %v583_v27  ;;  %v606_v39 = vmul.f32 %v596_v31, %v584_v28 }
 0x338   :  { %v623_v58 = vmul.f32 %v616_v15, %v603_v32  ;;  %v624_v40 = vmul.f32 %v616_v15, %v604_v35  ;;  %v625_v63 = vmul.f32 %v616_v15, %v605_v36  ;;  %v626_v47 = vmul.f32 %v616_v15, %v606_v39 }
 0x339   :  { %v601_v42 = vpop.permute.xlu1 %600  ;;  %v636_v41 = vpop.permute.xlu0 %635 }
 0x33a   :  { %v607_v5 = vmul.f32 %v601_v42, %v585_v43  ;;  %v608_v6 = vmul.f32 %v601_v42, %v586_v48  ;;  %v609_v3 = vmul.f32 %v601_v42, %v587_v53  ;;  %v610_v29 = vmul.f32 %v601_v42, %v588_v44 }
 0x33b   :  { %v643_v7 = vadd.f32 %v636_v41, %v623_v58  ;;  %v644_v12 = vadd.f32 %v636_v41, %v624_v40  ;;  %v645_v18 = vadd.f32 %v636_v41, %v625_v63  ;;  %v646_v56 = vadd.f32 %v636_v41, %v626_v47 }
 0x33c   :  { %v627_v19 = vmul.f32 %v621_v16, %v607_v5  ;;  %v628_v54 = vmul.f32 %v621_v16, %v608_v6  ;;  %v629_v20 = vmul.f32 %v621_v16, %v609_v3  ;;  %v630_v57 = vmul.f32 %v621_v16, %v610_v29  ;;  %v1551_v16 = vld [vmem:[%s2154_s4 + $0x8] sm:$0xff]  }
 0x33d   :  { %v641_v27 = vpop.permute.xlu1 %640  ;;  %v651_v15 = vmax.f32 %v643_v7, 0.0  ;;  %v653_v32 = vmax.f32 %v645_v18, 0.0  ;;  %v652_v35 = vmax.f32 %v644_v12, 0.0  ;;  %v654_v36 = vmax.f32 %v646_v56, 0.0 }
 0x33e   :  { %v647_v55 = vadd.f32 %v641_v27, %v627_v19  ;;  %v648_v28 = vadd.f32 %v641_v27, %v628_v54  ;;  %v649_v30 = vadd.f32 %v641_v27, %v629_v20  ;;  %v650_v31 = vadd.f32 %v641_v27, %v630_v57 }
 0x340   :  { %v655_v39 = vmax.f32 %v647_v55, 0.0  ;;  %v657_v43 = vmax.f32 %v649_v30, 0.0  ;;  %v656_v48 = vmax.f32 %v648_v28, 0.0  ;;  %v658_v53 = vmax.f32 %v650_v31, 0.0 }
 0x342   :  { %v660_v44 = vpack.c.bf16 %v656_v48, %v652_v35  ;;  %v662_v58 = vpack.c.bf16 %v658_v53, %v654_v36  ;;  %v659_v40 = vpack.c.bf16 %v655_v39, %v651_v15  ;;  %v661_v63 = vpack.c.bf16 %v657_v43, %v653_v32 }
 0x344   :  { %687 = vmatprep.subr.bf16.mxu0 %v660_v44  ;;  %730 = vmatprep.subr.bf16.mxu1 %v662_v58 }
 0x345   :  { %688 = vmatpush1.bf16.msra.mxu0 %v659_v40  ;;  %731 = vmatpush1.bf16.msra.mxu1 %v661_v63 }
 0x346   :  { %1469 = vmatprep.subr.bf16.mxu0 %v1703_v51  ;;  %1501 = vmatprep.subr.bf16.mxu1 %v1705_v52  ;;  %v2165_v51 = vld [vmem:[#allocation3_spill] sm:$0xff]  ;;  %v672_v52 = vpop.permute.xlu0 %671 }
 0x348   :  { %1220 = vmatmul.mubr.msk.bf16.vlgmr.msra.gmra.mrb[16].mxu0 %vm293_vm3, %v1551_v16  ;;  %1221 = vmatmul.mubr.msk.bf16.vlgmr.msra.gmra.mrb[16].mxu1 %vm293_vm3, %v1551_v16 }
 0x349   :  { %1471 = vmatpush3.bf16.msra.mxu0 %v1728_v60  ;;  %1503 = vmatpush3.bf16.msra.mxu1 %v1730_v61  ;;  %v677_v60 = vpop.permute.xlu1 %676 }
 0x34a   :  { %1473 = vmatprep.subr.bf16.mxu0 %v1740_v0  ;;  %1505 = vmatprep.subr.bf16.mxu1 %v1742_v1 }
 0x34d   :  { %1475 = vmatpush3.bf16.msra.mxu0 %v1766_v9  ;;  %1507 = vmatpush3.bf16.msra.mxu1 %v1768_v10 }
 0x34e   :  { %1477 = vmatprep.subr.bf16.mxu0 %v1778_v13  ;;  %1509 = vmatprep.subr.bf16.mxu1 %v1780_v14 }
 0x351   :  { %1479 = vmatpush3.bf16.msra.mxu0 %v1802_v21  ;;  %1511 = vmatpush3.bf16.msra.mxu1 %v1804_v22 }
 0x352   :  { %1481 = vmatprep.subr.bf16.mxu0 %v1814_v25  ;;  %1513 = vmatprep.subr.bf16.mxu1 %v1816_v26 }
 0x355   :  { %1483 = vmatpush3.bf16.msra.mxu0 %v1838_v33  ;;  %1515 = vmatpush3.bf16.msra.mxu1 %v1840_v34 }
 0x356   :  { %1485 = vmatprep.subr.bf16.mxu0 %v1850_v37  ;;  %1517 = vmatprep.subr.bf16.mxu1 %v1852_v38 }
 0x359   :  { %1487 = vmatpush3.bf16.msra.mxu0 %v1874_v45  ;;  %1519 = vmatpush3.bf16.msra.mxu1 %v1876_v46 }
 0x35a   :  { %1489 = vmatprep.subr.bf16.mxu0 %v1886_v49  ;;  %1521 = vmatprep.subr.bf16.mxu1 %v1888_v50 }
 0x35d   :  { %1491 = vmatpush3.bf16.msra.mxu0 %v1910_v59  ;;  %1523 = vmatpush3.bf16.msra.mxu1 %v1912_v62 }
 0x35e   :  { %1493 = vmatprep.subr.bf16.mxu0 %v1919_v2  ;;  %1525 = vmatprep.subr.bf16.mxu1 %v1921_v4 }
 0x361   :  { %1495 = vmatpush3.bf16.msra.mxu0 %v1934_v8  ;;  %1527 = vmatpush3.bf16.msra.mxu1 %v1936_v11  ;;  %v2166_v11 = vmov 0  }
 0x362   :  { %1497 = vmatprep.subr.bf16.mxu0 %v1951_v17  ;;  %1529 = vmatprep.subr.bf16.mxu1 %v1962_v23 }
 0x365   :  { %1499 = vmatpush3.bf16.msra.mxu0 %v1964_v24  ;;  %1531 = vmatpush3.bf16.msra.mxu1 %v2165_v51 }
 0x41b   :  { %v721_v61 = vpop.f32.mrb[16].mxu0  ;;  %v764_v0 = vpop.f32.mrb[16].mxu1 }
 0x41c   :  { %v723_v1 = vpop.f32.mrb[17].mxu0  ;;  %v766_v9 = vpop.f32.mrb[17].mxu1  ;;  %v2087_v22 = vadd.f32 %v721_v61, %v672_v52  ;;  %v2089_v25 = vadd.f32 %v764_v0, %v672_v52 }
 0x41d   :  { %v2083_v10 = vadd.f32 %v723_v1, %v672_v52  ;;  %v2085_v13 = vadd.f32 %v766_v9, %v672_v52  ;;  %v725_v14 = vpop.f32.mrb[18].mxu0  ;;  %v768_v21 = vpop.f32.mrb[18].mxu1  ;;  %v1224_v1 = vld [vmem:[%s2157_s7 + $0x10] sm:$0xff] }
 0x41e   :  { %v727_v26 = vpop.f32.mrb[19].mxu0  ;;  %v770_v33 = vpop.f32.mrb[19].mxu1  ;;  %v2101_v38 = vadd.f32 %v725_v14, %v677_v60  ;;  %v2103_v45 = vadd.f32 %v768_v21, %v677_v60  ;;  %v773_v50 = vmul.f32 %v2087_v22, %v2087_v22  ;;  %v775_v59 = vmul.f32 %v2089_v25, %v2089_v25  ;;  %v1225_v14 = vld [vmem:[%s2157_s7 + $0x18] sm:$0xff] }
 0x41f   :  { %v2091_v34 = vadd.f32 %v727_v26, %v677_v60  ;;  %v2093_v37 = vadd.f32 %v770_v33, %v677_v60  ;;  %845 = vmatprep.mubr.f32.mxu0 %v2083_v10  ;;  %930 = vmatprep.mubr.f32.mxu1 %v2085_v13  ;;  %v774_v46 = vmul.f32 %v2083_v10, %v2083_v10  ;;  %v1007_v21 = vpop.permute.xlu0 %1006  ;;  %v1012_v26 = vpop.permute.xlu1 %1011 }
 0x420   :  { %846 = vmatmul.mubr.f32.vlgmr.msra.gmra.mrb[20].mxu0 %v2087_v22  ;;  %931 = vmatmul.mubr.f32.vlgmr.msra.gmra.mrb[20].mxu1 %v2089_v25  ;;  %v776_v49 = vmul.f32 %v2085_v13, %v2085_v13  ;;  %v777_v4 = vmul.f32 %v2101_v38, %v2101_v38  ;;  %v779_v8 = vmul.f32 %v2103_v45, %v2103_v45 }
 0x421   :  { %850 = vmatprep.mubr.f32.mxu0 %v2091_v34  ;;  %935 = vmatprep.mubr.f32.mxu1 %v2093_v37  ;;  %v778_v62 = vmul.f32 %v2091_v34, %v2091_v34  ;;  %v780_v2 = vmul.f32 %v2093_v37, %v2093_v37 }
 0x424   :  { %851 = vmatmul.mubr.f32.gmra.mrb[22].mxu0 %v2101_v38  ;;  %936 = vmatmul.mubr.f32.gmra.mrb[22].mxu1 %v2103_v45 }
 0x425   :  { %855 = vmatprep.mubr.f32.mxu0 %v774_v46  ;;  %940 = vmatprep.mubr.f32.mxu1 %v776_v49 }
 0x428   :  { %856 = vmatmul.mubr.f32.gmra.mrb[24].mxu0 %v773_v50  ;;  %941 = vmatmul.mubr.f32.gmra.mrb[24].mxu1 %v775_v59 }
 0x429   :  { %860 = vmatprep.mubr.f32.mxu0 %v778_v62  ;;  %945 = vmatprep.mubr.f32.mxu1 %v780_v2 }
 0x42c   :  { %861 = vmatmul.mubr.f32.gmra.mrb[26].mxu0 %v777_v4  ;;  %946 = vmatmul.mubr.f32.gmra.mrb[26].mxu1 %v779_v8 }
 0x42d   :  { %1093 = vmatprep.mubr.bf16.mxu0 %v2166_v11  ;;  %1134 = vmatprep.mubr.bf16.mxu1 %v2166_v11 }
 0x4f3   :  { %v1348_v17 = vpop.f32.mrb[20].mxu0  ;;  %v1392_v23 = vpop.f32.mrb[20].mxu1 }
 0x4f4   :  { %v1349_v24 = vpop.f32.mrb[21].mxu0  ;;  %v1393_v47 = vpop.f32.mrb[21].mxu1 }
 0x4f5   :  { %v1350_v42 = vadd.f32 %v1349_v24, %v1348_v17  ;;  %v1394_v41 = vadd.f32 %v1393_v47, %v1392_v23 }
 0x4f7   :  { %v933_v5 = vadd.f32 %v1394_v41, %v1350_v42  ;;  %v1351_v6 = vpop.f32.mrb[22].mxu0  ;;  %v1395_v3 = vpop.f32.mrb[22].mxu1 }
 0x4f8   :  { %v1352_v29 = vpop.f32.mrb[23].mxu0  ;;  %v1396_v7 = vpop.f32.mrb[23].mxu1 }
 0x4f9   :  { %v951_v12 = vmul.f32 0.0025510204, %v933_v5  ;;  %v1353_v18 = vadd.f32 %v1352_v29, %v1351_v6  ;;  %v1397_v56 = vadd.f32 %v1396_v7, %v1395_v3 }
 0x4fb   :  { %v938_v19 = vadd.f32 %v1397_v56, %v1353_v18  ;;  %v1398_v54 = vpop.f32.mrb[24].mxu1  ;;  %963 = vperm.xlu0 %1535, %v951_v12   ;;  %v1354_v20 = vpop.f32.mrb[24].mxu0  ;;  %v955_v39 = vmul.f32 %v951_v12, %v951_v12 }
 0x4fc   :  { %v1355_v57 = vpop.f32.mrb[25].mxu0  ;;  %v1399_v27 = vpop.f32.mrb[25].mxu1 }
 0x4fd   :  { %v952_v55 = vmul.f32 0.0025510204, %v938_v19  ;;  %v1356_v28 = vadd.f32 %v1355_v57, %v1354_v20  ;;  %v1400_v30 = vadd.f32 %v1399_v27, %v1398_v54 }
 0x4ff   :  { %v943_v31 = vadd.f32 %v1400_v30, %v1356_v28  ;;  %v1401_v15 = vpop.f32.mrb[26].mxu1  ;;  %968 = vperm.xlu1 %1536, %v952_v55   ;;  %v1357_v32 = vpop.f32.mrb[26].mxu0  ;;  %v956_v40 = vmul.f32 %v952_v55, %v952_v55 }
 0x500   :  { %v1358_v35 = vpop.f32.mrb[27].mxu0  ;;  %v1402_v36 = vpop.f32.mrb[27].mxu1 }
 0x501   :  { %v953_v43 = vmul.f32 0.0025510204, %v943_v31  ;;  %v1359_v48 = vadd.f32 %v1358_v35, %v1357_v32  ;;  %v1403_v53 = vadd.f32 %v1402_v36, %v1401_v15 }
 0x503   :  { %v957_v44 = vsub.f32 %v953_v43, %v955_v39  ;;  %v948_v58 = vadd.f32 %v1403_v53, %v1359_v48 }
 0x505   :  { %v959_v63 = vmax.f32 %v957_v44, 0.0  ;;  %v954_v16 = vmul.f32 0.0025510204, %v948_v58  ;;  %v1055_v58 = vld [vmem:[%s2158_s8] sm:$0x1] }
 0x507   :  { %v979_v51 = vadd.f32 1e-05, %v959_v63  ;;  %v958_v52 = vsub.f32 %v954_v16, %v956_v40  ;;  %v1057_v40 = vstv %s2159_s9 }
 0x509   :  { %1556 = vrsqrt.f32 %v979_v51  ;;  %v960_v60 = vmax.f32 %v958_v52, 0.0 }
 0x50b   :  { %v980_v61 = vadd.f32 1e-05, %v960_v60 }
 0x50d   :  { %1558 = vrsqrt.f32 %v980_v61 }
 0x513   :  { %v1557_v0 = vpop.eup %1556 }
 0x514   :  { %985 = vperm.xlu0 %1535, %v1557_v0  }
 0x517   :  { %v1559_v9 = vpop.eup %1558 }
 0x518   :  { %990 = vperm.xlu1 %1536, %v1559_v9   ;;  %1027 = vperm.xlu0 %1535, %v1224_v1  }
 0x51c   :  { %1032 = vperm.xlu1 %1536, %v1225_v14  }
 0x57a   :  { %v964_v33 = vpop.permute.xlu0 %963 }
 0x57b   :  { %v971_v46 = vsub.f32 %v2087_v22, %v964_v33  ;;  %v972_v49 = vsub.f32 %v2083_v10, %v964_v33  ;;  %v973_v50 = vsub.f32 %v2089_v25, %v964_v33  ;;  %v974_v59 = vsub.f32 %v2085_v13, %v964_v33 }
 0x57e   :  { %v969_v62 = vpop.permute.xlu1 %968 }
 0x57f   :  { %v975_v23 = vsub.f32 %v2101_v38, %v969_v62  ;;  %v976_v24 = vsub.f32 %v2091_v34, %v969_v62  ;;  %v977_v47 = vsub.f32 %v2103_v45, %v969_v62  ;;  %v978_v22 = vsub.f32 %v2093_v37, %v969_v62 }
 0x593   :  { %v986_v2 = vpop.permute.xlu0 %985 }
 0x594   :  { %v993_v4 = vmul.f32 %v986_v2, %v971_v46  ;;  %v994_v8 = vmul.f32 %v986_v2, %v972_v49  ;;  %v995_v11 = vmul.f32 %v986_v2, %v973_v50  ;;  %v996_v17 = vmul.f32 %v986_v2, %v974_v59 }
 0x596   :  { %v1014_v42 = vmul.f32 %v1007_v21, %v993_v4  ;;  %v1015_v10 = vmul.f32 %v1007_v21, %v994_v8  ;;  %v1016_v41 = vmul.f32 %v1007_v21, %v995_v11  ;;  %v1017_v25 = vmul.f32 %v1007_v21, %v996_v17 }
 0x597   :  { %v991_v5 = vpop.permute.xlu1 %990  ;;  %v1028_v13 = vpop.permute.xlu0 %1027 }
 0x598   :  { %v997_v6 = vmul.f32 %v991_v5, %v975_v23  ;;  %v998_v3 = vmul.f32 %v991_v5, %v976_v24  ;;  %v999_v29 = vmul.f32 %v991_v5, %v977_v47  ;;  %v1000_v7 = vmul.f32 %v991_v5, %v978_v22 }
 0x599   :  { %v1035_v12 = vadd.f32 %v1028_v13, %v1014_v42  ;;  %v1036_v18 = vadd.f32 %v1028_v13, %v1015_v10  ;;  %v1037_v56 = vadd.f32 %v1028_v13, %v1016_v41  ;;  %v1038_v38 = vadd.f32 %v1028_v13, %v1017_v25 }
 0x59a   :  { %v1018_v19 = vmul.f32 %v1012_v26, %v997_v6  ;;  %v1019_v34 = vmul.f32 %v1012_v26, %v998_v3  ;;  %v1020_v54 = vmul.f32 %v1012_v26, %v999_v29  ;;  %v1021_v45 = vmul.f32 %v1012_v26, %v1000_v7 }
 0x59b   :  { %v1033_v20 = vpop.permute.xlu1 %1032  ;;  %v1043_v28 = vmax.f32 %v1035_v12, 0.0  ;;  %v1044_v30 = vmax.f32 %v1036_v18, 0.0  ;;  %v1045_v31 = vmax.f32 %v1037_v56, 0.0  ;;  %v1046_v15 = vmax.f32 %v1038_v38, 0.0 }
 0x59c   :  { %v1039_v37 = vadd.f32 %v1033_v20, %v1018_v19  ;;  %v1040_v57 = vadd.f32 %v1033_v20, %v1019_v34  ;;  %v1041_v27 = vadd.f32 %v1033_v20, %v1020_v54  ;;  %v1042_v55 = vadd.f32 %v1033_v20, %v1021_v45 }
 0x59d   :  { %v1578_v10 = vmov 1966171168   ;;  %v1172_v25 = vlaneseq }
 0x59e   :  { %v1047_v32 = vmax.f32 %v1039_v37, 0.0  ;;  %v1048_v35 = vmax.f32 %v1040_v57, 0.0  ;;  %v1049_v36 = vmax.f32 %v1041_v27, 0.0  ;;  %v1050_v39 = vmax.f32 %v1042_v55, 0.0 }
 0x59f   :  { %v1170_v41 = vunpack.c.l.s4 %v1578_v10  ;;  %v1173_v13 = vshrl.u32 %v1172_v25, 7  ;;  %vm1194_vm4 = vcmp.lt.s32.totalorder %v1172_v25, 512 }
 0x5a0   :  { %v1051_v43 = vpack.c.bf16 %v1047_v32, %v1043_v28  ;;  %v1053_v48 = vpack.c.bf16 %v1049_v36, %v1045_v31  ;;  %v1052_v53 = vpack.c.bf16 %v1048_v35, %v1044_v30  ;;  %v1054_v44 = vpack.c.bf16 %v1050_v39, %v1046_v15 }
 0x5a1   :  { %v1171_v5 = vunpack.c.0.s8 %v1170_v41 }
 0x5a2   :  { %1061 = vmatprep.subr.bf16.mxu0 %v1052_v53  ;;  %1102 = vmatprep.subr.bf16.mxu1 %v1054_v44 }
 0x5a3   :  { %1062 = vmatpush1.bf16.msra.mxu0 %v1051_v43  ;;  %1103 = vmatpush1.bf16.msra.mxu1 %v1053_v48  ;;  %v1174_v29 = vsub.s32 %v1171_v5, %v1173_v13 }
 0x5a6   :  { %1226 = vmatmul.mubr.msk.bf16.vlgmr.msra.gmra.mrb[28].mxu0 %vm293_vm3, %v1055_v58  ;;  %1227 = vmatmul.mubr.msk.bf16.vlgmr.msra.gmra.mrb[28].mxu1 %vm293_vm3, %v1055_v58 }
 0x679   :  { %v1095_v63 = vpop.f32.mrb[28].mxu0  ;;  %v1136_v16 = vpop.f32.mrb[28].mxu1 }
 0x67a   :  { %v1096_v51 = vadd.f32 %v1095_v63, %v1057_v40  ;;  %v1137_v52 = vadd.f32 %v1136_v16, %v1057_v40  ;;  %v1097_v60 = vpop.f32.mrb[29].mxu0  ;;  %v1138_v61 = vpop.f32.mrb[29].mxu1 }
 0x67b   :  { %v1098_v0 = vadd.f32 %v1097_v60, %v1057_v40  ;;  %v1139_v1 = vadd.f32 %v1138_v61, %v1057_v40  ;;  %v1099_v9 = vpop.f32.mrb[30].mxu0  ;;  %v1140_v14 = vpop.f32.mrb[30].mxu1 }
 0x67c   :  { %v1143_v21 = vsub.f32 0.0, %v1096_v51  ;;  %v1145_v26 = vsub.f32 0.0, %v1137_v52  ;;  %v1100_v33 = vpop.f32.mrb[31].mxu0  ;;  %v1141_v46 = vpop.f32.mrb[31].mxu1 }
 0x67d   :  { %v1144_v49 = vsub.f32 0.0, %v1098_v0  ;;  %v1146_v50 = vsub.f32 0.0, %v1139_v1 }
 0x67e   :  { %v1147_v59 = vmul.f32 1.442695, %v1143_v21  ;;  %v1151_v62 = vmul.f32 1.442695, %v1145_v26 }
 0x67f   :  { %v1149_v2 = vmul.f32 1.442695, %v1144_v49  ;;  %v1153_v4 = vmul.f32 1.442695, %v1146_v50 }
 0x680   :  { %1560 = vpow2.f32 %v1147_v59 }
 0x681   :  { %1562 = vpow2.f32 %v1151_v62 }
 0x682   :  { %1564 = vpow2.f32 %v1149_v2 }
 0x683   :  { %1566 = vpow2.f32 %v1153_v4 }
 0x68a   :  { %v1561_v8 = vpop.eup %1560 }
 0x68b   :  { %v1563_v11 = vpop.eup %1562  ;;  %v1155_v17 = vadd.f32 1.0, %v1561_v8 }
 0x68c   :  { %v1565_v23 = vpop.eup %1564  ;;  %v1157_v24 = vadd.f32 1.0, %v1563_v11 }
 0x68d   :  { %v1567_v47 = vpop.eup %1566  ;;  %1568 = vrcp.f32 %v1155_v17  ;;  %v1156_v22 = vadd.f32 1.0, %v1565_v23 }
 0x68e   :  { %1570 = vrcp.f32 %v1157_v24  ;;  %v1158_v42 = vadd.f32 1.0, %v1567_v47 }
 0x68f   :  { %1572 = vrcp.f32 %v1156_v22 }
 0x690   :  { %1574 = vrcp.f32 %v1158_v42 }
 0x697   :  { %v1569_v6 = vpop.eup %1568 }
 0x698   :  { %v1571_v3 = vpop.eup %1570 }
 0x699   :  { %v1573_v7 = vpop.eup %1572 }
 0x69a   :  { %v1575_v12 = vpop.eup %1574  ;;  %v1167_v18 = vcombine.low %v1569_v6, %v1573_v7 }
 0x69b   :  { %v1168_v56 = vcombine.low %v1571_v3, %v1575_v12 }
 0x69c   :  { %v1175_v38 = vrot.slane %v1167_v18, %v1174_v29 }
 0x69d   :  { %v1182_v19 = vrot.slane %v1168_v56, %v1174_v29 }
 0x69f   :  { %v1183_v34 = vcombine.low %v1175_v38, %v1182_v19 }
 0x6a1   :  { %v1190_v54 = vrot.slane %v1183_v34, %v1174_v29 }
 0x6a3   :  { %1196 = vst.msk [vmem:[%s2160_s10] sm:$0xf] %vm1194_vm4, %v1190_v54 }

</bundles_post_ra>
